<compile_context>
chip_gen: v5e
topology: v5e:2x2
jax: 0.10.0
libtpu: 0.0.40
codegen_flags: <defaults>
</compile_context>

<pallas_src>
import jax
import jax.numpy as jnp
from jax.experimental import pallas as pl
from jax.experimental.pallas import tpu as pltpu


def _ffn_kernel(x_ref, w1_ref, w2_ref, o_ref, acc_ref):
    # Grid: (row_tiles, hidden_tiles). Hidden is the reduction axis (last, "arbitrary").
    j = pl.program_id(1)

    @pl.when(j == 0)
    def _():
        acc_ref[...] = jnp.zeros_like(acc_ref)

    # Hidden slice of the up-projection: (tm, th) in f32 on the MXU.
    h = jnp.dot(x_ref[...], w1_ref[...], preferred_element_type=jnp.float32)
    # SiLU = h * sigmoid(h); exp goes to the EUP, mul/add to the VPU.
    h = h * (1.0 / (1.0 + jnp.exp(-h)))

    # Accumulate the down-projection contribution of this hidden slice.
    acc_ref[...] += jnp.dot(h.astype(w2_ref.dtype), w2_ref[...],
                            preferred_element_type=jnp.float32)

    @pl.when(j == pl.num_programs(1) - 1)
    def _():
        o_ref[...] = acc_ref[...].astype(o_ref.dtype)


def _round_up(a: int, b: int) -> int:
    return ((a + b - 1) // b) * b


def feed_forward(x: jax.Array, w1: jax.Array, w2: jax.Array,
                 *, tile_rows: int = 256, tile_hidden: int = 512) -> jax.Array:
    """Equivalent of torch: w2(F.silu(w1(x))) with nn.Linear weight layout.

    w1: (hidden_dim, dim)   -> up projection   (x @ w1.T)
    w2: (dim, hidden_dim)   -> down projection (h @ w2.T)
    """
    orig_shape = x.shape
    dim = orig_shape[-1]
    hidden = w1.shape[0]
    assert w1.shape == (hidden, dim), (w1.shape, (hidden, dim))
    assert w2.shape == (dim, hidden), (w2.shape, (dim, hidden))

    rows = 1
    for s in orig_shape[:-1]:
        rows *= s
    x2d = x.reshape(rows, dim)

    # Row tile: big enough to amortize per-step overhead, rounded to the dtype's
    # sublane packing (8 for f32, 16 for bf16, 32 for 8-bit), but never larger than
    # the (rounded) row count.
    itemsize = x.dtype.itemsize
    sublane = {4: 8, 2: 16, 1: 32}.get(itemsize, 8)
    tm = min(_round_up(tile_rows, sublane), _round_up(rows, sublane))
    padded_rows = _round_up(rows, tm)
    if padded_rows != rows:
        # Only pay the extra HBM pass when the row count is ragged w.r.t. the tile.
        x2d = jnp.pad(x2d, ((0, padded_rows - rows), (0, 0)))

    # Hidden (reduction) tile: multiple of 128 lanes that divides hidden, else full.
    th = min(tile_hidden, hidden)
    if hidden % th != 0 or th % 128 != 0:
        th = hidden

    # MXU-friendly weight layouts (transpose once in the wrapper, not per step).
    w1_t = w1.T  # (dim, hidden)
    w2_t = w2.T  # (hidden, dim)

    grid = (padded_rows // tm, hidden // th)

    # VMEM budget: double-buffered x/w1/w2/out tiles + f32 accumulator + intermediates.
    vmem_need = (2 * (tm * dim + dim * th + th * dim + tm * dim) * itemsize
                 + tm * dim * 4 + 2 * tm * th * 4)
    vmem_limit = min(max(2 * vmem_need, 32 * 1024 * 1024), 64 * 1024 * 1024)

    cost = pl.CostEstimate(
        flops=4 * rows * dim * hidden,            # two matmuls
        transcendentals=rows * hidden,            # sigmoid in SiLU
        bytes_accessed=(2 * rows * dim) * itemsize
                       + (w1.size + w2.size) * w1.dtype.itemsize,
    )

    # TODO(synk): for dim < 128 (like this toy test) the output stores are masked
    # (partial-lane vst); real model dims are multiples of 128, so not handled here.
    out2d = pl.pallas_call(
        _ffn_kernel,
        out_shape=jax.ShapeDtypeStruct((padded_rows, dim), x.dtype),
        grid_spec=pltpu.PrefetchScalarGridSpec(
            num_scalar_prefetch=0,
            grid=grid,
            in_specs=[
                pl.BlockSpec((tm, dim), lambda i, j: (i, 0)),   # x rows
                pl.BlockSpec((dim, th), lambda i, j: (0, j)),   # W1^T hidden slice
                pl.BlockSpec((th, dim), lambda i, j: (j, 0)),   # W2^T hidden slice
            ],
            out_specs=pl.BlockSpec((tm, dim), lambda i, j: (i, 0)),
            scratch_shapes=[pltpu.VMEM((tm, dim), jnp.float32)],
        ),
        compiler_params=pltpu.CompilerParams(
            dimension_semantics=("parallel", "arbitrary"),
            vmem_limit_bytes=vmem_limit,
        ),
        cost_estimate=cost,
    )(x2d, w1_t, w2_t)

    if padded_rows != rows:
        out2d = out2d[:rows]
    return out2d.reshape(orig_shape)


def _ffn_ref(x, w1, w2):
    h = x.astype(jnp.float32) @ w1.astype(jnp.float32).T
    h = h * jax.nn.sigmoid(h)
    return (h @ w2.astype(jnp.float32).T).astype(x.dtype)


if __name__ == "__main__":
    key = jax.random.PRNGKey(0)
    k_x, k_w1, k_w2 = jax.random.split(key, 3)

    batch, seq, dim = 2, 8, 32
    hidden_factor = 4
    hidden = dim * hidden_factor  # 128

    x = jax.random.normal(k_x, (batch, seq, dim), dtype=jnp.float32)
    # Deterministic "Linear" weights in PyTorch layout (out_features, in_features).
    w1 = jax.random.normal(k_w1, (hidden, dim), dtype=jnp.float32) * (1.0 / dim ** 0.5)
    w2 = jax.random.normal(k_w2, (dim, hidden), dtype=jnp.float32) * (1.0 / hidden ** 0.5)

    out = feed_forward(x, w1, w2)
    out = jax.block_until_ready(out)

    ref = _ffn_ref(x, w1, w2)
    assert out.shape == x.shape and out.dtype == x.dtype
    assert jnp.allclose(out.astype(jnp.float32), ref.astype(jnp.float32),
                        atol=1e-2, rtol=1e-2)

    print("KERNEL_OK")
</pallas_src>

<mosaic_0001>
module attributes {stable_mosaic.version = 11 : i64} {
  func.func @_ffn_kernel(%arg0: i32, %arg1: i32, %arg2: memref<16x32xf32, #tpu.memory_space<vmem>>, %arg3: memref<32x128xf32, #tpu.memory_space<vmem>>, %arg4: memref<128x32xf32, #tpu.memory_space<vmem>>, %arg5: memref<16x32xf32, #tpu.memory_space<vmem>>, %arg6: memref<16x32xf32, #tpu.memory_space<vmem>>) attributes {dimension_semantics = [#tpu.dimension_semantics<parallel>, #tpu.dimension_semantics<arbitrary>], iteration_bounds = array<i64: 1, 1>, scalar_prefetch = 0 : i64, scratch_operands = 1 : i64, tpu.core_type = #tpu.core_type<tc>, window_params = [{transform_indices = @transform_0, window_bounds = array<i64: 16, 32>}, {transform_indices = @transform_1, window_bounds = array<i64: 32, 128>}, {transform_indices = @transform_2, window_bounds = array<i64: 128, 32>}, {transform_indices = @transform_3, window_bounds = array<i64: 16, 32>}]} {
    %c0_i32 = arith.constant 0 : i32
    %0 = arith.cmpi eq, %arg1, %c0_i32 : i32
    %1 = arith.extui %0 : i1 to i32
    %c0_i32_0 = arith.constant 0 : i32
    %2 = arith.cmpi ne, %1, %c0_i32_0 : i32
    scf.if %2 {
      %cst_16 = arith.constant 0.000000e+00 : f32
      %22 = vector.broadcast %cst_16 : f32 to vector<16x32xf32>
      %c0_17 = arith.constant 0 : index
      %c0_18 = arith.constant 0 : index
      %23 = vector.load %arg6[%c0_17, %c0_18] : memref<16x32xf32, #tpu.memory_space<vmem>>, vector<16x32xf32>
      tpu.vector_store %arg6[%c0_17, %c0_18], %22 {strides = array<i32>} : memref<16x32xf32, #tpu.memory_space<vmem>>, vector<16x32xf32>,
    } else {
    }
    %c0 = arith.constant 0 : index
    %c0_1 = arith.constant 0 : index
    %3 = vector.load %arg2[%c0, %c0_1] : memref<16x32xf32, #tpu.memory_space<vmem>>, vector<16x32xf32>
    %c0_2 = arith.constant 0 : index
    %c0_3 = arith.constant 0 : index
    %4 = vector.load %arg3[%c0_2, %c0_3] : memref<32x128xf32, #tpu.memory_space<vmem>>, vector<32x128xf32>
    %cst = arith.constant dense<0.000000e+00> : vector<16x128xf32>
    %5 = tpu.matmul %3, %4, %cst {dimension_numbers = #tpu.dot_dimension_numbers<[1], [0], [0], [1], [0, 0, 1, 1], [], []>} : vector<16x32xf32>, vector<32x128xf32>, vector<16x128xf32> -> vector<16x128xf32>
    %cst_4 = arith.constant 0.000000e+00 : f32
    %6 = vector.broadcast %cst_4 : f32 to vector<16x128xf32>
    %7 = arith.subf %6, %5 : vector<16x128xf32>
    %8 = math.exp %7 : vector<16x128xf32>
    %cst_5 = arith.constant 1.000000e+00 : f32
    %9 = vector.broadcast %cst_5 : f32 to vector<16x128xf32>
    %10 = arith.addf %9, %8 : vector<16x128xf32>
    %cst_6 = arith.constant 1.000000e+00 : f32
    %11 = vector.broadcast %cst_6 : f32 to vector<16x128xf32>
    %12 = arith.divf %11, %10 : vector<16x128xf32>
    %13 = arith.mulf %5, %12 : vector<16x128xf32>
    %c0_7 = arith.constant 0 : index
    %c0_8 = arith.constant 0 : index
    %14 = vector.load %arg6[%c0_7, %c0_8] : memref<16x32xf32, #tpu.memory_space<vmem>>, vector<16x32xf32>
    %c0_9 = arith.constant 0 : index
    %c0_10 = arith.constant 0 : index
    %15 = vector.load %arg4[%c0_9, %c0_10] : memref<128x32xf32, #tpu.memory_space<vmem>>, vector<128x32xf32>
    %cst_11 = arith.constant dense<0.000000e+00> : vector<16x32xf32>
    %16 = tpu.matmul %13, %15, %cst_11 {dimension_numbers = #tpu.dot_dimension_numbers<[1], [0], [0], [1], [0, 0, 1, 1], [], []>} : vector<16x128xf32>, vector<128x32xf32>, vector<16x32xf32> -> vector<16x32xf32>
    %17 = arith.addf %14, %16 : vector<16x32xf32>
    %c0_12 = arith.constant 0 : index
    %c0_13 = arith.constant 0 : index
    %18 = vector.load %arg6[%c0_12, %c0_13] : memref<16x32xf32, #tpu.memory_space<vmem>>, vector<16x32xf32>
    tpu.vector_store %arg6[%c0_12, %c0_13], %17 {strides = array<i32>} : memref<16x32xf32, #tpu.memory_space<vmem>>, vector<16x32xf32>,
    %c0_i32_14 = arith.constant 0 : i32
    %19 = arith.cmpi eq, %arg1, %c0_i32_14 : i32
    %20 = arith.extui %19 : i1 to i32
    %c0_i32_15 = arith.constant 0 : i32
    %21 = arith.cmpi ne, %20, %c0_i32_15 : i32
    scf.if %21 {
      %c0_16 = arith.constant 0 : index
      %c0_17 = arith.constant 0 : index
      %22 = vector.load %arg6[%c0_16, %c0_17] : memref<16x32xf32, #tpu.memory_space<vmem>>, vector<16x32xf32>
      %c0_18 = arith.constant 0 : index
      %c0_19 = arith.constant 0 : index
      %23 = vector.load %arg5[%c0_18, %c0_19] : memref<16x32xf32, #tpu.memory_space<vmem>>, vector<16x32xf32>
      tpu.vector_store %arg5[%c0_18, %c0_19], %22 {strides = array<i32>} : memref<16x32xf32, #tpu.memory_space<vmem>>, vector<16x32xf32>,
    } else {
    }
    return
  }
  func.func @transform_0(%arg0: i32, %arg1: i32) -> (i32, i32) {
    %c0_i32 = arith.constant 0 : i32
    %c0_i32_0 = arith.constant 0 : i32
    return %arg0, %c0_i32 : i32, i32
  }
  func.func @transform_1(%arg0: i32, %arg1: i32) -> (i32, i32) {
    %c0_i32 = arith.constant 0 : i32
    %c0_i32_0 = arith.constant 0 : i32
    return %c0_i32, %arg1 : i32, i32
  }
  func.func @transform_2(%arg0: i32, %arg1: i32) -> (i32, i32) {
    %c0_i32 = arith.constant 0 : i32
    %c0_i32_0 = arith.constant 0 : i32
    return %arg1, %c0_i32 : i32, i32
  }
  func.func @transform_3(%arg0: i32, %arg1: i32) -> (i32, i32) {
    %c0_i32 = arith.constant 0 : i32
    %c0_i32_0 = arith.constant 0 : i32
    return %arg0, %c0_i32 : i32, i32
  }
}

</mosaic_0001>

<bundles_post_ra>
// kernel: tpu_custom_call.1
= control target key start
LH: loop header
LB: loop body
LE: loop exit
PB: predicated region body
PF: predicated region fallthrough
CT: control target
= control target key end

     0   :  { %s325_s0 = inlined_call_operand.vmem [shape: f32[16,32], index: 0, kind: input, shape index: {}]   ;;  %s326_s1 = inlined_call_operand.vmem [shape: f32[32,128], index: 1, kind: input, shape index: {}]   ;;  %s327_s2 = inlined_call_operand.vmem [shape: f32[128,32], index: 2, kind: input, shape index: {}]   ;;  %s328_s3 = inlined_call_operand.hbm [shape: f32[16,32], index: 3, kind: output, shape index: {}]  }
   0x1   :  { %v27_v0 = vld [vmem:[%s326_s1 + $0x18] sm:$0xff]  ;;  %v26_v1 = vld [vmem:[%s326_s1 + $0x10] sm:$0xff]  ;;  %v25_v2 = vld [vmem:[%s326_s1 + $0x8] sm:$0xff] }
   0x2   :  { %47 = vmatpush.msra.mxu0 %v27_v0 }
   0x3   :  { %8 = vsyncpa [#allocation4], 0  ;;  %v24_v3 = vld [vmem:[%s326_s1] sm:$0xff]  ;;  %vm19_vm0 = vcmask 261120   ;;  %v23_v5 = vld [vmem:[%s325_s0 + $0x8] sm:$0xff]  ;;  %v224_v27 = vmov 0.0  }
   0x4   :  { %48 = vmatpush.msra.mxu0 %v26_v1  ;;  %v22_v4 = vld [vmem:[%s325_s0] sm:$0xff]  ;;  %v115_v6 = vld [vmem:[%s327_s2 + $0x78] sm:$0xff]  ;;  %v114_v7 = vld [vmem:[%s327_s2 + $0x70] sm:$0xff]  ;;  %20 = vst.msk [vmem:[#allocation2] sm:$0xff] %vm19_vm0, %v224_v27  ;;  %s156_s0 = sshll.u32 %s328_s3, 4  ;;  %s226_s29 = smov 128   ;;  %s157_s0 = int_to_ptr.hbm [resolvable:$true] %s156_s0 }
   0x5   :  { %116 = vmatpush.msra.mxu1 %v115_v6  ;;  %170 = vmatpush.msra.mxu2 %v115_v6  ;;  %v113_v8 = vld [vmem:[%s327_s2 + $0x68] sm:$0xff]  ;;  %v112_v9 = vld [vmem:[%s327_s2 + $0x60] sm:$0xff]  ;;  %v111_v10 = vld [vmem:[%s327_s2 + $0x58] sm:$0xff]  ;;  %21 = vst.msk [vmem:[#allocation2 + $0x8] sm:$0xff] %vm19_vm0, %v224_v27  ;;  %s227_s30 = smov 8  }
   0x6   :  { %49 = vmatpush.msra.mxu0 %v25_v2  ;;  %v110_v11 = vld [vmem:[%s327_s2 + $0x50] sm:$0xff]  ;;  %v109_v12 = vld [vmem:[%s327_s2 + $0x48] sm:$0xff]  ;;  %v108_v13 = vld [vmem:[%s327_s2 + $0x40] sm:$0xff] }
   0x7   :  { %117 = vmatpush.msra.mxu1 %v114_v7  ;;  %171 = vmatpush.msra.mxu2 %v114_v7  ;;  %v107_v14 = vld [vmem:[%s327_s2 + $0x38] sm:$0xff]  ;;  %v106_v15 = vld [vmem:[%s327_s2 + $0x30] sm:$0xff]  ;;  %v105_v16 = vld [vmem:[%s327_s2 + $0x28] sm:$0xff] }
   0x8   :  { %50 = vmatpush.msra.mxu0 %v24_v3  ;;  %v104_v17 = vld [vmem:[%s327_s2 + $0x20] sm:$0xff]  ;;  %v103_v18 = vld [vmem:[%s327_s2 + $0x18] sm:$0xff]  ;;  %v102_v19 = vld [vmem:[%s327_s2 + $0x10] sm:$0xff] }
   0x9   :  { %168 = vmatmul.msk.f32.vlgmr.msra.gmra.mxu0 %vm19_vm0, %v22_v4  ;;  %118 = vmatpush.msra.mxu1 %v113_v8  ;;  %v101_v20 = vld [vmem:[%s327_s2 + $0x8] sm:$0xff]  ;;  %v100_v21 = vld [vmem:[%s327_s2] sm:$0xff]  ;;  %s225_s2 = smov [#allocation3]  }
   0xa   :  { %172 = vmatpush.msra.mxu2 %v113_v8  ;;  %s154_s26 = sshll.u32 %s225_s2, 4  ;;  %s155_s26 = int_to_ptr.vmem [resolvable:$true] %s154_s26 }
   0xb   :  { %119 = vmatpush.msra.mxu1 %v112_v9  ;;  %v98_v55 = vld [vmem:[#allocation2] sm:$0xff] }
   0xc   :  { %173 = vmatpush.msra.mxu2 %v112_v9  ;;  %v99_v59 = vld [vmem:[#allocation2 + $0x8] sm:$0xff] }
   0xd   :  { %120 = vmatpush.msra.mxu1 %v111_v10 }
   0xe   :  { %174 = vmatpush.msra.mxu2 %v111_v10 }
   0xf   :  { %121 = vmatpush.msra.mxu1 %v110_v11 }
  0x10   :  { %175 = vmatpush.msra.mxu2 %v110_v11 }
  0x11   :  { %169 = vmatmul.msk.f32.gmra.mxu0 %vm19_vm0, %v23_v5  ;;  %122 = vmatpush.msra.mxu1 %v109_v12 }
  0x12   :  { %176 = vmatpush.msra.mxu2 %v109_v12 }
  0x13   :  { %123 = vmatpush.msra.mxu1 %v108_v13 }
  0x14   :  { %177 = vmatpush.msra.mxu2 %v108_v13 }
  0x15   :  { %124 = vmatpush.msra.mxu1 %v107_v14 }
  0x16   :  { %178 = vmatpush.msra.mxu2 %v107_v14 }
  0x17   :  { %125 = vmatpush.msra.mxu1 %v106_v15 }
  0x18   :  { %179 = vmatpush.msra.mxu2 %v106_v15 }
  0x19   :  { %126 = vmatpush.msra.mxu1 %v105_v16 }
  0x1a   :  { %180 = vmatpush.msra.mxu2 %v105_v16 }
  0x1b   :  { %127 = vmatpush.msra.mxu1 %v104_v17 }
  0x1c   :  { %181 = vmatpush.msra.mxu2 %v104_v17 }
  0x1d   :  { %128 = vmatpush.msra.mxu1 %v103_v18 }
  0x1e   :  { %182 = vmatpush.msra.mxu2 %v103_v18 }
  0x1f   :  { %129 = vmatpush.msra.mxu1 %v102_v19 }
  0x20   :  { %183 = vmatpush.msra.mxu2 %v102_v19 }
  0x21   :  { %130 = vmatpush.msra.mxu1 %v101_v20 }
  0x22   :  { %184 = vmatpush.msra.mxu2 %v101_v20 }
  0x23   :  { %131 = vmatpush.msra.mxu1 %v100_v21 }
  0x24   :  { %185 = vmatpush.msra.mxu2 %v100_v21 }
  0x86   :  { %v52_v22 = vpop.f32.mrf.mxu0 }
  0x87   :  { %v58_v23 = vsub.f32 0.0, %v52_v22 }
  0x89   :  { %v60_v24 = vmul.f32 1.442695, %v58_v23 }
  0x8b   :  { %190 = vpow2.f32 %v60_v24 }
  0x8e   :  { %v55_v25 = vpop.f32.mrf.mxu0 }
  0x8f   :  { %v59_v26 = vsub.f32 0.0, %v55_v25 }
  0x91   :  { %v191_v28 = vpop.eup %190  ;;  %v62_v29 = vmul.f32 1.442695, %v59_v26 }
  0x92   :  { %v64_v30 = vadd.f32 1.0, %v191_v28 }
  0x93   :  { %192 = vpow2.f32 %v62_v29 }
  0x94   :  { %194 = vrcp.f32 %v64_v30  ;;  %v77_v36 = vand.u32 2147483648, %v64_v30  ;;  %v75_v38 = vand.u32 2147483647, %v64_v30  ;;  %vm71_vm2 = vweird.f32 %v64_v30 }
  0x96   :  { %v78_v41 = vor.u32 1.1754944e-38, %v77_v36  ;;  %vm76_vm4 = vcmp.eq.f32.partialorder %v75_v38, 8.507059e+37 }
  0x99   :  { %v193_v31 = vpop.eup %192 }
  0x9a   :  { %v195_v32 = vpop.eup %194  ;;  %v65_v33 = vadd.f32 1.0, %v193_v31 }
  0x9b   :  { %v67_v34 = vmul.f32 %v195_v32, %v64_v30  ;;  %vm72_vm1 = vweird.f32 %v195_v32 }
  0x9c   :  { %196 = vrcp.f32 %v65_v33  ;;  %vm73_vm3 = vmor %vm71_vm2, %vm72_vm1  ;;  %v92_v47 = vand.u32 2147483648, %v65_v33  ;;  %v90_v49 = vand.u32 2147483647, %v65_v33  ;;  %vm86_vm6 = vweird.f32 %v65_v33 }
  0x9d   :  { %v68_v35 = vsub.f32 1.0, %v67_v34 }
  0x9e   :  { %v93_v51 = vor.u32 1.1754944e-38, %v92_v47  ;;  %vm91_vm8 = vcmp.eq.f32.partialorder %v90_v49, 8.507059e+37 }
  0x9f   :  { %v69_v37 = vmul.f32 %v195_v32, %v68_v35 }
  0xa1   :  { %v70_v39 = vadd.f32 %v195_v32, %v69_v37 }
  0xa2   :  { %v197_v40 = vpop.eup %196 }
  0xa3   :  { %v82_v42 = vmul.f32 %v197_v40, %v65_v33  ;;  %v74_v43 = vsel %vm73_vm3, %v195_v32, %v70_v39  ;;  %vm87_vm5 = vweird.f32 %v197_v40 }
  0xa4   :  { %v79_v44 = vsel %vm76_vm4, %v78_v41, %v74_v43  ;;  %vm88_vm7 = vmor %vm86_vm6, %vm87_vm5 }
  0xa5   :  { %v83_v45 = vsub.f32 1.0, %v82_v42  ;;  %v96_v46 = vmul.f32 %v79_v44, %v52_v22 }
  0xa7   :  { %v84_v48 = vmul.f32 %v197_v40, %v83_v45  ;;  %132 = vmatmul.f32.vlgmr.msra.gmra.mxu1 %v96_v46 }
  0xa9   :  { %v85_v50 = vadd.f32 %v197_v40, %v84_v48 }
  0xab   :  { %v89_v52 = vsel %vm88_vm7, %v197_v40, %v85_v50 }
  0xac   :  { %v94_v53 = vsel %vm91_vm8, %v93_v51, %v89_v52 }
  0xad   :  { %v97_v54 = vmul.f32 %v94_v53, %v55_v25 }
  0xaf   :  { %135 = vmatmul.f32.vlgmr.msra.gmra.mxu2 %v97_v54 }
 0x124   :  { %v133_v56 = vpop.f32.mrf.mxu1 }
 0x125   :  { %v139_v57 = vadd.f32 %v133_v56, %v98_v55 }
 0x127   :  { %141 = vst.msk [vmem:[#allocation2] sm:$0xff] %vm19_vm0, %v139_v57 }
 0x12e   :  { %v146_v58 = vld [vmem:[#allocation2] sm:$0xff] }
 0x12f   :  { %148 = vst.msk [vmem:[#allocation3] sm:$0xff] %vm19_vm0, %v146_v58 }
 0x132   :  { %v136_v60 = vpop.f32.mrf.mxu2 }
 0x133   :  { %v140_v61 = vadd.f32 %v136_v60, %v99_v59 }
 0x135   :  { %142 = vst.msk [vmem:[#allocation2 + $0x8] sm:$0xff] %vm19_vm0, %v140_v61 }
 0x13c   :  { %v147_v62 = vld [vmem:[#allocation2 + $0x8] sm:$0xff] }
 0x13d   :  { %149 = vst.msk [vmem:[#allocation3 + $0x8] sm:$0xff] %vm19_vm0, %v147_v62 }
 0x13e   :  { %162 = dma.vmem_to_hbm [thread:$0]  %s155_s26, 256, %s157_s0, [#allocation4], %s226_s29, %s226_s29, %s227_s30  }
 0x13f   :  { %222 = dma.done.wait [#allocation4], 256  }
 0x140   :  { %223 = vsyncadd [#allocation4], 4294967040 }
 0x141   :  { %167 = vsyncpa [#allocation4], 1 }

</bundles_post_ra>
